<compile_context>
chip_gen: v7x
topology: tpu7x:2x2x1
jax: 0.10.0
libtpu: 0.0.40
codegen_flags: <defaults>
</compile_context>

<pallas_src>
import jax
import jax.numpy as jnp
import numpy as np
from jax.experimental import pallas as pl
from jax.experimental.pallas import tpu as pltpu

# ---------------- configuration ----------------
N = 2
H = W = 16
CHANNELS = (4, 16, 32, 32)          # channels[0..3]
C0, C1, C2, C3 = CHANNELS
KH = KW = 3
PAD = 1
Hp, Wp = H + 2 * PAD, W + 2 * PAD
HW = H * W
NHW = N * H * W                     # 512 -> lane axis inside the kernel
KKC0 = KH * KW * C0                 # 36  -> contraction dim of the im2col matmul
LRELU_SLOPE = 0.2

# Matmul-operand dtype. jnp.float32 matches PyTorch f32 semantics exactly;
# on v6e/v7x this can be flipped to jnp.bfloat16 (bf16-native MXU, 2x throughput,
# f32 accumulation kept via preferred_element_type).
MATMUL_DTYPE = jnp.float32


# ---------------- Pallas kernel ----------------
def feat_disc_kernel(patches_ref, w1t_ref, w2t_ref, w3t_ref, pool_ref, out_ref):
    # patches_ref: (KKC0, NHW)  = (36, 512)   im2col slab, channel-major / spatial-on-lanes
    # w1t_ref    : (C1, KKC0)   = (16, 36)
    # w2t_ref    : (C2, C1)     = (32, 16)
    # w3t_ref    : (C3, C2)     = (32, 32)
    # pool_ref   : (NHW, N)     = (512, 2)    block-diagonal 1/(H*W) averaging matrix
    # out_ref    : (C3, N)      = (32, 2)

    patches = patches_ref[...].astype(MATMUL_DTYPE)

    # --- Conv2dBlock 1: 3x3 conv as a single fused im2col matmul, bias=False ---
    h1 = jnp.dot(w1t_ref[...].astype(MATMUL_DTYPE), patches,
                 preferred_element_type=jnp.float32)           # (C1, NHW) = (16, 512)
    h1 = jnp.where(h1 > 0, h1, LRELU_SLOPE * h1)                # LeakyReLU(0.2), full vregs

    # --- Conv2dBlock 2: 1x1 conv == channel matmul ---
    h2 = jnp.dot(w2t_ref[...].astype(MATMUL_DTYPE), h1.astype(MATMUL_DTYPE),
                 preferred_element_type=jnp.float32)            # (C2, NHW) = (32, 512)
    h2 = jnp.where(h2 > 0, h2, LRELU_SLOPE * h2)                # LeakyReLU(0.2)

    # --- Global average pool (MXU ones-row matmul), commuted in front of conv3 ---
    pooled = jnp.dot(h2.astype(MATMUL_DTYPE), pool_ref[...].astype(MATMUL_DTYPE),
                     preferred_element_type=jnp.float32)        # (C2, N) = (32, 2)

    # --- Conv2dBlock 3: 1x1 conv (no norm, no activation) on the pooled features ---
    out_ref[...] = jnp.dot(w3t_ref[...].astype(MATMUL_DTYPE),
                           pooled.astype(MATMUL_DTYPE),
                           preferred_element_type=jnp.float32)  # (C3, N) = (32, 2)


def feat_discriminator(x_nchw, w1, w2, w3):
    """x_nchw: (N, C0, H, W) f32.  w1: (C1, C0, 3, 3), w2: (C2, C1, 1, 1),
    w3: (C3, C2, 1, 1) (PyTorch conv layouts).  Returns (N, C3) f32."""
    # ---- glue / layout plumbing (no compute): pad + im2col in channel-major layout ----
    xp = jnp.pad(x_nchw, ((0, 0), (0, 0), (PAD, PAD), (PAD, PAD)))   # (N, C0, Hp, Wp)

    taps = []
    for kh in range(KH):
        for kw in range(KW):
            t = xp[:, :, kh:kh + H, kw:kw + W]                 # (N, C0, H, W)
            t = jnp.transpose(t, (1, 0, 2, 3)).reshape(C0, NHW)
            taps.append(t)
    patches = jnp.concatenate(taps, axis=0)                    # (KKC0, NHW): rows = (kh,kw,c0)

    # Weights to channel-major matmul layouts; row order of w1t matches the patch rows.
    w1t = jnp.transpose(w1, (0, 2, 3, 1)).reshape(C1, KKC0)    # (C1, KH*KW*C0)
    w2t = w2.reshape(C2, C1)
    w3t = w3.reshape(C3, C2)

    # Block-diagonal average-pool matrix: pool[n*HW + i, n] = 1/(H*W).
    col_batch = jnp.arange(NHW) // HW
    pool = (col_batch[:, None] == jnp.arange(N)[None, :]).astype(jnp.float32) / HW

    flops = 2 * (C1 * KKC0 * NHW + C2 * C1 * NHW + C2 * NHW * N + C3 * C2 * N)
    bytes_accessed = 4 * (patches.size + w1t.size + w2t.size + w3t.size
                          + pool.size + C3 * N)

    out_t = pl.pallas_call(
        feat_disc_kernel,
        out_shape=jax.ShapeDtypeStruct((C3, N), jnp.float32),
        grid_spec=pltpu.PrefetchScalarGridSpec(
            num_scalar_prefetch=0,
            grid=(1,),                                          # single fused step
            in_specs=[
                pl.BlockSpec((KKC0, NHW), lambda i: (0, 0)),
                pl.BlockSpec((C1, KKC0), lambda i: (0, 0)),
                pl.BlockSpec((C2, C1), lambda i: (0, 0)),
                pl.BlockSpec((C3, C2), lambda i: (0, 0)),
                pl.BlockSpec((NHW, N), lambda i: (0, 0)),
            ],
            out_specs=pl.BlockSpec((C3, N), lambda i: (0, 0)),
        ),
        compiler_params=pltpu.CompilerParams(
            dimension_semantics=("arbitrary",)),
        cost_estimate=pl.CostEstimate(
            flops=flops, transcendentals=0, bytes_accessed=bytes_accessed),
    )(patches, w1t, w2t, w3t, pool)

    return out_t.T                                              # (N, C3)


# ---------------- pure-JAX reference (PyTorch f32 semantics) ----------------
def feat_discriminator_ref(x_nchw, w1, w2, w3):
    xp = jnp.pad(x_nchw, ((0, 0), (0, 0), (PAD, PAD), (PAD, PAD)))
    acc = jnp.zeros((N, C1, H, W), jnp.float32)
    for kh in range(KH):
        for kw in range(KW):
            acc = acc + jnp.einsum("nchw,oc->nohw",
                                   xp[:, :, kh:kh + H, kw:kw + W], w1[:, :, kh, kw])
    h1 = jnp.where(acc > 0, acc, LRELU_SLOPE * acc)
    h2 = jnp.einsum("nchw,oc->nohw", h1, w2[:, :, 0, 0])
    h2 = jnp.where(h2 > 0, h2, LRELU_SLOPE * h2)
    h3 = jnp.einsum("nchw,oc->nohw", h2, w3[:, :, 0, 0])
    return jnp.mean(h3, axis=(2, 3))


if __name__ == "__main__":
    key = jax.random.PRNGKey(0)
    kx, k1, k2, k3 = jax.random.split(key, 4)

    # deterministic inputs / parameters (Conv2d weights in PyTorch OIHW layout, bias=False)
    x = jax.random.normal(kx, (N, C0, H, W), jnp.float32)
    w1 = jax.random.normal(k1, (C1, C0, KH, KW), jnp.float32) * (
        1.0 / np.sqrt(KH * KW * C0))
    w2 = jax.random.normal(k2, (C2, C1, 1, 1), jnp.float32) * (1.0 / np.sqrt(C1))
    w3 = jax.random.normal(k3, (C3, C2, 1, 1), jnp.float32) * (1.0 / np.sqrt(C2))

    out = jax.block_until_ready(feat_discriminator(x, w1, w2, w3))
    ref = jax.block_until_ready(feat_discriminator_ref(x, w1, w2, w3))

    assert out.shape == (N, C3), out.shape
    tol = 1e-4 if MATMUL_DTYPE == jnp.float32 else 5e-2
    np.testing.assert_allclose(np.asarray(out), np.asarray(ref), rtol=tol, atol=tol)
    print("KERNEL_OK")
</pallas_src>

<mosaic_0001>
module attributes {stable_mosaic.version = 11 : i64} {
  func.func @feat_disc_kernel(%arg0: i32, %arg1: memref<36x512xf32, #tpu.memory_space<vmem>>, %arg2: memref<16x36xf32, #tpu.memory_space<vmem>>, %arg3: memref<32x16xf32, #tpu.memory_space<vmem>>, %arg4: memref<32x32xf32, #tpu.memory_space<vmem>>, %arg5: memref<512x2xf32, #tpu.memory_space<vmem>>, %arg6: memref<32x2xf32, #tpu.memory_space<vmem>>) attributes {dimension_semantics = [#tpu.dimension_semantics<arbitrary>], iteration_bounds = array<i64: 1>, scalar_prefetch = 0 : i64, scratch_operands = 0 : i64, tpu.core_type = #tpu.core_type<tc>, window_params = [{pipeline_mode = #tpu.pipeline_mode<synchronous>, transform_indices = @transform_0, window_bounds = array<i64: 36, 512>}, {pipeline_mode = #tpu.pipeline_mode<synchronous>, transform_indices = @transform_1, window_bounds = array<i64: 16, 36>}, {pipeline_mode = #tpu.pipeline_mode<synchronous>, transform_indices = @transform_2, window_bounds = array<i64: 32, 16>}, {pipeline_mode = #tpu.pipeline_mode<synchronous>, transform_indices = @transform_3, window_bounds = array<i64: 32, 32>}, {pipeline_mode = #tpu.pipeline_mode<synchronous>, transform_indices = @transform_4, window_bounds = array<i64: 512, 2>}, {pipeline_mode = #tpu.pipeline_mode<synchronous>, transform_indices = @transform_5, window_bounds = array<i64: 32, 2>}]} {
    %c0 = arith.constant 0 : index
    %c0_0 = arith.constant 0 : index
    %0 = vector.load %arg1[%c0, %c0_0] : memref<36x512xf32, #tpu.memory_space<vmem>>, vector<36x512xf32>
    %c0_1 = arith.constant 0 : index
    %c0_2 = arith.constant 0 : index
    %1 = vector.load %arg2[%c0_1, %c0_2] : memref<16x36xf32, #tpu.memory_space<vmem>>, vector<16x36xf32>
    %cst = arith.constant dense<0.000000e+00> : vector<16x512xf32>
    %2 = tpu.matmul %1, %0, %cst {dimension_numbers = #tpu.dot_dimension_numbers<[1], [0], [0], [1], [0, 0, 1, 1], [], []>} : vector<16x36xf32>, vector<36x512xf32>, vector<16x512xf32> -> vector<16x512xf32>
    %cst_3 = arith.constant 0.000000e+00 : f32
    %3 = vector.broadcast %cst_3 : f32 to vector<16x512xf32>
    %4 = arith.cmpf ogt, %2, %3 : vector<16x512xf32>
    %cst_4 = arith.constant 2.000000e-01 : f32
    %5 = vector.broadcast %cst_4 : f32 to vector<16x512xf32>
    %6 = arith.mulf %5, %2 : vector<16x512xf32>
    %7 = arith.select %4, %2, %6 : vector<16x512xi1>, vector<16x512xf32>
    %c0_5 = arith.constant 0 : index
    %c0_6 = arith.constant 0 : index
    %8 = vector.load %arg3[%c0_5, %c0_6] : memref<32x16xf32, #tpu.memory_space<vmem>>, vector<32x16xf32>
    %cst_7 = arith.constant dense<0.000000e+00> : vector<32x512xf32>
    %9 = tpu.matmul %8, %7, %cst_7 {dimension_numbers = #tpu.dot_dimension_numbers<[1], [0], [0], [1], [0, 0, 1, 1], [], []>} : vector<32x16xf32>, vector<16x512xf32>, vector<32x512xf32> -> vector<32x512xf32>
    %cst_8 = arith.constant 0.000000e+00 : f32
    %10 = vector.broadcast %cst_8 : f32 to vector<32x512xf32>
    %11 = arith.cmpf ogt, %9, %10 : vector<32x512xf32>
    %cst_9 = arith.constant 2.000000e-01 : f32
    %12 = vector.broadcast %cst_9 : f32 to vector<32x512xf32>
    %13 = arith.mulf %12, %9 : vector<32x512xf32>
    %14 = arith.select %11, %9, %13 : vector<32x512xi1>, vector<32x512xf32>
    %c0_10 = arith.constant 0 : index
    %c0_11 = arith.constant 0 : index
    %15 = vector.load %arg5[%c0_10, %c0_11] : memref<512x2xf32, #tpu.memory_space<vmem>>, vector<512x2xf32>
    %cst_12 = arith.constant dense<0.000000e+00> : vector<32x2xf32>
    %16 = tpu.matmul %14, %15, %cst_12 {dimension_numbers = #tpu.dot_dimension_numbers<[1], [0], [0], [1], [0, 0, 1, 1], [], []>} : vector<32x512xf32>, vector<512x2xf32>, vector<32x2xf32> -> vector<32x2xf32>
    %c0_13 = arith.constant 0 : index
    %c0_14 = arith.constant 0 : index
    %17 = vector.load %arg4[%c0_13, %c0_14] : memref<32x32xf32, #tpu.memory_space<vmem>>, vector<32x32xf32>
    %cst_15 = arith.constant dense<0.000000e+00> : vector<32x2xf32>
    %18 = tpu.matmul %17, %16, %cst_15 {dimension_numbers = #tpu.dot_dimension_numbers<[1], [0], [0], [1], [0, 0, 1, 1], [], []>} : vector<32x32xf32>, vector<32x2xf32>, vector<32x2xf32> -> vector<32x2xf32>
    %c0_16 = arith.constant 0 : index
    %c0_17 = arith.constant 0 : index
    %19 = vector.load %arg6[%c0_16, %c0_17] : memref<32x2xf32, #tpu.memory_space<vmem>>, vector<32x2xf32>
    tpu.vector_store %arg6[%c0_16, %c0_17], %18 {strides = array<i32>} : memref<32x2xf32, #tpu.memory_space<vmem>>, vector<32x2xf32>,
    return
  }
  func.func @transform_0(%arg0: i32) -> (i32, i32) {
    %c0_i32 = arith.constant 0 : i32
    %c0_i32_0 = arith.constant 0 : i32
    %c0_i32_1 = arith.constant 0 : i32
    return %c0_i32, %c0_i32_0 : i32, i32
  }
  func.func @transform_1(%arg0: i32) -> (i32, i32) {
    %c0_i32 = arith.constant 0 : i32
    %c0_i32_0 = arith.constant 0 : i32
    %c0_i32_1 = arith.constant 0 : i32
    return %c0_i32, %c0_i32_0 : i32, i32
  }
  func.func @transform_2(%arg0: i32) -> (i32, i32) {
    %c0_i32 = arith.constant 0 : i32
    %c0_i32_0 = arith.constant 0 : i32
    %c0_i32_1 = arith.constant 0 : i32
    return %c0_i32, %c0_i32_0 : i32, i32
  }
  func.func @transform_3(%arg0: i32) -> (i32, i32) {
    %c0_i32 = arith.constant 0 : i32
    %c0_i32_0 = arith.constant 0 : i32
    %c0_i32_1 = arith.constant 0 : i32
    return %c0_i32, %c0_i32_0 : i32, i32
  }
  func.func @transform_4(%arg0: i32) -> (i32, i32) {
    %c0_i32 = arith.constant 0 : i32
    %c0_i32_0 = arith.constant 0 : i32
    %c0_i32_1 = arith.constant 0 : i32
    return %c0_i32, %c0_i32_0 : i32, i32
  }
  func.func @transform_5(%arg0: i32) -> (i32, i32) {
    %c0_i32 = arith.constant 0 : i32
    %c0_i32_0 = arith.constant 0 : i32
    %c0_i32_1 = arith.constant 0 : i32
    return %c0_i32, %c0_i32_0 : i32, i32
  }
}

</mosaic_0001>

<bundles_post_ra>
// kernel: tpu_custom_call.1
= control target key start
LH: loop header
LB: loop body
LE: loop exit
PB: predicated region body
PF: predicated region fallthrough
CT: control target
= control target key end

     0   :  { %v1059_v3 = vmov 0.0   ;;  %vm49_vm0 = vcmask 1043456   ;;  %vm42_vm1 = vcmask 293888   ;;  %vm244_vm10 = vcmask 130048   ;;  %s1417_s0 = inlined_call_operand.vmem [shape: f32[36,512], index: 0, kind: input, shape index: {}]   ;;  %s1418_s1 = inlined_call_operand.vmem [shape: f32[16,36], index: 1, kind: input, shape index: {}]   ;;  %s1419_s4 = inlined_call_operand.vmem [shape: f32[512,2], index: 4, kind: input, shape index: {}]   ;;  %s1420_s2 = inlined_call_operand.vmem [shape: f32[32,16], index: 2, kind: input, shape index: {}]   ;;  %s1421_s3 = inlined_call_operand.vmem [shape: f32[32,32], index: 3, kind: input, shape index: {}]   ;;  %s1422_s5 = inlined_call_operand.vmem [shape: f32[32,2], index: 5, kind: output, shape index: {}]  }
   0x1   :  { %v21_v0 = vld [vmem:[%s1417_s0 + $0x8] sm:$0xff]  ;;  %v23_v2 = vld [vmem:[%s1417_s0 + $0x18] sm:$0xff]  ;;  %126 = vmatprep.mubr.f32.mxu0 %v1059_v3  ;;  %203 = vmatprep.mubr.f32.mxu1 %v1059_v3  ;;  %v20_v6 = vld [vmem:[%s1417_s0] sm:$0xff] }
   0x2   :  { %v25_v1 = vld [vmem:[%s1417_s0 + $0x28] sm:$0xff]  ;;  %v27_v5 = vld [vmem:[%s1417_s0 + $0x38] sm:$0xff]  ;;  %v24_v7 = vld [vmem:[%s1417_s0 + $0x20] sm:$0xff] }
   0x3   :  { %v958_v4 = vpack.c.bf16 %v25_v1, %v21_v0  ;;  %v966_v8 = vpack.c.bf16 %v27_v5, %v23_v2  ;;  %v960_v9 = vpack.c.bf16 %v24_v7, %v20_v6  ;;  %v22_v10 = vld [vmem:[%s1417_s0 + $0x10] sm:$0xff]  ;;  %v29_v12 = vld [vmem:[%s1417_s0 + $0x48] sm:$0xff]  ;;  %v31_v15 = vld [vmem:[%s1417_s0 + $0x58] sm:$0xff] }
   0x4   :  { %v26_v11 = vld [vmem:[%s1417_s0 + $0x30] sm:$0xff]  ;;  %v33_v14 = vld [vmem:[%s1417_s0 + $0x68] sm:$0xff]  ;;  %v35_v16 = vld [vmem:[%s1417_s0 + $0x78] sm:$0xff] }
   0x5   :  { %959 = vmatprep.subr.bf16.mxu0 %v958_v4  ;;  %v968_v13 = vpack.c.bf16 %v26_v11, %v22_v10  ;;  %967 = vmatprep.subr.bf16.mxu1 %v966_v8  ;;  %v962_v17 = vpack.c.bf16 %v33_v14, %v29_v12  ;;  %v970_v18 = vpack.c.bf16 %v35_v16, %v31_v15  ;;  %v28_v19 = vld [vmem:[%s1417_s0 + $0x40] sm:$0xff]  ;;  %v30_v21 = vld [vmem:[%s1417_s0 + $0x50] sm:$0xff]  ;;  %v37_v25 = vld [vmem:[%s1417_s0 + $0x88] sm:$0xf] }
   0x6   :  { %961 = vmatpush1.bf16.msra.mxu0 %v960_v9  ;;  %v32_v20 = vld [vmem:[%s1417_s0 + $0x60] sm:$0xff]  ;;  %v34_v23 = vld [vmem:[%s1417_s0 + $0x70] sm:$0xff]  ;;  %v39_v26 = vld [vmem:[%s1417_s0 + $0x98] sm:$0xf] }
   0x7   :  { %969 = vmatpush1.bf16.msra.mxu1 %v968_v13  ;;  %v964_v22 = vpack.c.bf16 %v32_v20, %v28_v19  ;;  %963 = vmatprep.subr.bf16.mxu0 %v962_v17  ;;  %v972_v24 = vpack.c.bf16 %v34_v23, %v30_v21  ;;  %v36_v27 = vld [vmem:[%s1417_s0 + $0x80] sm:$0xf]  ;;  %v38_v28 = vld [vmem:[%s1417_s0 + $0x90] sm:$0xf]  ;;  %v41_v30 = vld [vmem:[%s1418_s1 + $0x8] sm:$0xff] }
   0x8   :  { %971 = vmatprep.subr.bf16.mxu1 %v970_v18  ;;  %v40_v29 = vld [vmem:[%s1418_s1] sm:$0xff]  ;;  %v500_v45 = vld [vmem:[%s1419_s4 + $0x88] sm:$0xff]  ;;  %v501_v6 = vld [vmem:[%s1419_s4 + $0x90] sm:$0xff] }
   0x9   :  { %v499_v44 = vld [vmem:[%s1419_s4 + $0x80] sm:$0xff]  ;;  %v532_v52 = vld [vmem:[%s1419_s4 + $0x188] sm:$0xff]  ;;  %v502_v7 = vld [vmem:[%s1419_s4 + $0x98] sm:$0xff] }
   0xa   :  { %965 = vmatpush1.bf16.msra.mxu0 %v964_v22  ;;  %v531_v46 = vld [vmem:[%s1419_s4 + $0x180] sm:$0xff]  ;;  %v982_v63 = vpack.c.bf16 %v500_v45, %v499_v44  ;;  %v484_v2 = vld [vmem:[%s1419_s4 + $0x8] sm:$0xff]  ;;  %v533_v8 = vld [vmem:[%s1419_s4 + $0x190] sm:$0xff]  ;;  %v986_v15 = vpack.c.bf16 %v502_v7, %v501_v6 }
   0xb   :  { %973 = vmatpush1.bf16.msra.mxu1 %v972_v24  ;;  %828 = vmatprep.subr.msk.mxu0 %vm49_vm0, %v37_v25  ;;  %v1014_v0 = vpack.c.bf16 %v532_v52, %v531_v46  ;;  %v483_v1 = vld [vmem:[%s1419_s4] sm:$0xff]  ;;  %v516_v5 = vld [vmem:[%s1419_s4 + $0x108] sm:$0xff]  ;;  %v534_v9 = vld [vmem:[%s1419_s4 + $0x198] sm:$0xff] }
   0xc   :  { %832 = vmatprep.subr.msk.mxu1 %vm49_vm0, %v39_v26  ;;  %v515_v4 = vld [vmem:[%s1419_s4 + $0x100] sm:$0xff]  ;;  %v984_v11 = vpack.c.bf16 %v484_v2, %v483_v1  ;;  %v485_v13 = vld [vmem:[%s1419_s4 + $0x10] sm:$0xff]  ;;  %v486_v14 = vld [vmem:[%s1419_s4 + $0x18] sm:$0xff]  ;;  %v1018_v16 = vpack.c.bf16 %v534_v9, %v533_v8 }
   0xd   :  { %v240_v10 = vld [vmem:[%s1420_s2] sm:$0xff]  ;;  %v1016_v12 = vpack.c.bf16 %v516_v5, %v515_v4  ;;  %v517_v17 = vld [vmem:[%s1419_s4 + $0x110] sm:$0xff]  ;;  %v518_v18 = vld [vmem:[%s1419_s4 + $0x118] sm:$0xff]  ;;  %v988_v24 = vpack.c.bf16 %v486_v14, %v485_v13 }
   0xe   :  { %829 = vmatpush1.msk.msra.mxu0 %vm49_vm0, %v36_v27  ;;  %v503_v19 = vld [vmem:[%s1419_s4 + $0xa0] sm:$0xff]  ;;  %v504_v20 = vld [vmem:[%s1419_s4 + $0xa8] sm:$0xff]  ;;  %v1020_v25 = vpack.c.bf16 %v518_v18, %v517_v17  ;;  %v522_v44 = vld [vmem:[%s1419_s4 + $0x138] sm:$0xff] }
   0xf   :  { %833 = vmatpush1.msk.msra.mxu1 %vm49_vm0, %v38_v28  ;;  %830 = vmatmul.mubr.msk.f32.vlgmr.msra.gmra.mrb[0].mxu0 %vm42_vm1, %v40_v29  ;;  %v535_v21 = vld [vmem:[%s1419_s4 + $0x1a0] sm:$0xff]  ;;  %v536_v22 = vld [vmem:[%s1419_s4 + $0x1a8] sm:$0xff]  ;;  %v990_v28 = vpack.c.bf16 %v504_v20, %v503_v19  ;;  %v525_v4 = vld [vmem:[%s1419_s4 + $0x150] sm:$0xff] }
  0x10   :  { %834 = vmatmul.mubr.msk.f32.vlgmr.msra.gmra.mrb[0].mxu1 %vm42_vm1, %v40_v29  ;;  %132 = vmatprep.mubr.f32.mxu0 %v1059_v3  ;;  %v241_v23 = vld [vmem:[%s1420_s2 + $0x8] sm:$0xff]  ;;  %v487_v26 = vld [vmem:[%s1419_s4 + $0x20] sm:$0xff]  ;;  %v1022_v29 = vpack.c.bf16 %v536_v22, %v535_v21  ;;  %v526_v5 = vld [vmem:[%s1419_s4 + $0x158] sm:$0xff] }
  0x11   :  { %209 = vmatprep.mubr.f32.mxu1 %v1059_v3  ;;  %v488_v27 = vld [vmem:[%s1419_s4 + $0x28] sm:$0xff]  ;;  %v507_v45 = vld [vmem:[%s1419_s4 + $0xc0] sm:$0xff]  ;;  %v513_v20 = vld [vmem:[%s1419_s4 + $0xf0] sm:$0xff] }
  0x12   :  { %v508_v46 = vld [vmem:[%s1419_s4 + $0xc8] sm:$0xff]  ;;  %v491_v52 = vld [vmem:[%s1419_s4 + $0x40] sm:$0xff]  ;;  %v514_v21 = vld [vmem:[%s1419_s4 + $0xf8] sm:$0xff] }
  0x13   :  { %831 = vmatmul.mubr.msk.f32.gmra.mrb[2].mxu0 %vm42_vm1, %v41_v30  ;;  %v511_v6 = vld [vmem:[%s1419_s4 + $0xe0] sm:$0xff]  ;;  %v512_v7 = vld [vmem:[%s1419_s4 + $0xe8] sm:$0xff]  ;;  %v545_v22 = vld [vmem:[%s1419_s4 + $0x1f0] sm:$0xff] }
  0x14   :  { %835 = vmatmul.mubr.msk.f32.gmra.mrb[2].mxu1 %vm42_vm1, %v41_v30  ;;  %321 = vmatprep.mubr.f32.mxu0 %v1059_v3  ;;  %v519_v30 = vld [vmem:[%s1419_s4 + $0x120] sm:$0xff]  ;;  %v544_v9 = vld [vmem:[%s1419_s4 + $0x1e8] sm:$0xff]  ;;  %v1006_v13 = vpack.c.bf16 %v512_v7, %v511_v6 }
  0x15   :  { %410 = vmatprep.mubr.f32.mxu1 %v1059_v3  ;;  %v543_v8 = vld [vmem:[%s1419_s4 + $0x1e0] sm:$0xff]  ;;  %v528_v17 = vld [vmem:[%s1419_s4 + $0x168] sm:$0xff] }
  0x16   :  { %v1038_v14 = vpack.c.bf16 %v544_v9, %v543_v8 }
  0xe2   :  { %v128_v31 = vpop.f32.mrb[0].mxu0 }
  0xe3   :  { %v224_v32 = vmul.f32 0.2, %v128_v31  ;;  %v205_v33 = vpop.f32.mrb[0].mxu1  ;;  %v130_v34 = vpop.f32.mrb[1].mxu0  ;;  %vm216_vm2 = vcmp.gt.f32.partialorder %v128_v31, 0.0 }
  0xe4   :  { %v226_v35 = vmul.f32 0.2, %v205_v33  ;;  %v207_v36 = vpop.f32.mrb[1].mxu1  ;;  %vm218_vm3 = vcmp.gt.f32.partialorder %v205_v33, 0.0  ;;  %v225_v37 = vmul.f32 0.2, %v130_v34 }
  0xe5   :  { %v227_v38 = vmul.f32 0.2, %v207_v36  ;;  %v232_v40 = vsel %vm216_vm2, %v128_v31, %v224_v32  ;;  %vm217_vm4 = vcmp.gt.f32.partialorder %v130_v34, 0.0  ;;  %vm219_vm6 = vcmp.gt.f32.partialorder %v207_v36, 0.0  ;;  %v520_v31 = vld [vmem:[%s1419_s4 + $0x128] sm:$0xff]  ;;  %v505_v32 = vld [vmem:[%s1419_s4 + $0xb0] sm:$0xff] }
  0xe6   :  { %v134_v39 = vpop.f32.mrb[2].mxu0  ;;  %v234_v53 = vsel %vm218_vm3, %v205_v33, %v226_v35  ;;  %v233_v54 = vsel %vm217_vm4, %v130_v34, %v225_v37  ;;  %v506_v33 = vld [vmem:[%s1419_s4 + $0xb8] sm:$0xff]  ;;  %v537_v34 = vld [vmem:[%s1419_s4 + $0x1b0] sm:$0xff]  ;;  %v992_v37 = vpack.c.bf16 %v488_v27, %v487_v26 }
  0xe7   :  { %vm220_vm5 = vcmp.gt.f32.partialorder %v134_v39, 0.0  ;;  %v228_v41 = vmul.f32 0.2, %v134_v39  ;;  %v211_v42 = vpop.f32.mrb[2].mxu1  ;;  %v136_v43 = vpop.f32.mrb[3].mxu0  ;;  %v235_v57 = vsel %vm219_vm6, %v207_v36, %v227_v38  ;;  %v538_v35 = vld [vmem:[%s1419_s4 + $0x1b8] sm:$0xff]  ;;  %v1024_v38 = vpack.c.bf16 %v520_v31, %v519_v30 }
  0xe8   :  { %vm222_vm7 = vcmp.gt.f32.partialorder %v211_v42, 0.0  ;;  %v230_v47 = vmul.f32 0.2, %v211_v42  ;;  %vm221_vm8 = vcmp.gt.f32.partialorder %v136_v43, 0.0  ;;  %v213_v48 = vpop.f32.mrb[3].mxu1  ;;  %v242_v36 = vld [vmem:[%s1420_s2 + $0x10] sm:$0xff] }
  0xe9   :  { %v236_v49 = vsel %vm220_vm5, %v134_v39, %v228_v41  ;;  %v229_v50 = vmul.f32 0.2, %v136_v43  ;;  %vm223_vm9 = vcmp.gt.f32.partialorder %v213_v48, 0.0  ;;  %v231_v51 = vmul.f32 0.2, %v213_v48  ;;  %v489_v39 = vld [vmem:[%s1419_s4 + $0x30] sm:$0xff] }
  0xea   :  { %v976_v55 = vpack.c.bf16 %v236_v49, %v232_v40  ;;  %v238_v56 = vsel %vm222_vm7, %v211_v42, %v230_v47  ;;  %v490_v40 = vld [vmem:[%s1419_s4 + $0x38] sm:$0xff]  ;;  %v994_v41 = vpack.c.bf16 %v506_v33, %v505_v32  ;;  %v1026_v42 = vpack.c.bf16 %v538_v35, %v537_v34  ;;  %v539_v47 = vld [vmem:[%s1419_s4 + $0x1c0] sm:$0xff] }
  0xeb   :  { %v980_v58 = vpack.c.bf16 %v238_v56, %v234_v53  ;;  %v237_v59 = vsel %vm221_vm8, %v136_v43, %v229_v50  ;;  %v239_v60 = vsel %vm223_vm9, %v213_v48, %v231_v51  ;;  %v521_v43 = vld [vmem:[%s1419_s4 + $0x130] sm:$0xff]  ;;  %v540_v48 = vld [vmem:[%s1419_s4 + $0x1c8] sm:$0xff]  ;;  %v243_v49 = vld [vmem:[%s1420_s2 + $0x18] sm:$0xff]  ;;  %v996_v50 = vpack.c.bf16 %v490_v40, %v489_v39 }
  0xec   :  { %v974_v61 = vpack.c.bf16 %v237_v59, %v233_v54  ;;  %v978_v62 = vpack.c.bf16 %v239_v60, %v235_v57  ;;  %v1028_v51 = vpack.c.bf16 %v522_v44, %v521_v43  ;;  %v492_v53 = vld [vmem:[%s1419_s4 + $0x48] sm:$0xff]  ;;  %v998_v54 = vpack.c.bf16 %v508_v46, %v507_v45  ;;  %v509_v57 = vld [vmem:[%s1419_s4 + $0xd0] sm:$0xff]  ;;  %v542_v60 = vld [vmem:[%s1419_s4 + $0x1d8] sm:$0xff] }
  0xed   :  { %v524_v56 = vld [vmem:[%s1419_s4 + $0x148] sm:$0xff]  ;;  %v541_v59 = vld [vmem:[%s1419_s4 + $0x1d0] sm:$0xff]  ;;  %v498_v26 = vld [vmem:[%s1419_s4 + $0x78] sm:$0xff] }
  0xee   :  { %975 = vmatprep.subr.bf16.mxu0 %v974_v61  ;;  %979 = vmatprep.subr.bf16.mxu1 %v978_v62  ;;  %v1000_v61 = vpack.c.bf16 %v492_v53, %v491_v52  ;;  %v1034_v2 = vpack.c.bf16 %v542_v60, %v541_v59  ;;  %v530_v30 = vld [vmem:[%s1419_s4 + $0x178] sm:$0xff] }
  0xef   :  { %977 = vmatpush1.bf16.msra.mxu0 %v976_v55  ;;  %981 = vmatpush1.bf16.msra.mxu1 %v980_v58  ;;  %v523_v55 = vld [vmem:[%s1419_s4 + $0x140] sm:$0xff]  ;;  %v510_v58 = vld [vmem:[%s1419_s4 + $0xd8] sm:$0xff] }
  0xf0   :  { %983 = vmatprep.subr.bf16.mxu0 %v982_v63  ;;  %1015 = vmatprep.subr.bf16.mxu1 %v1014_v0  ;;  %v1032_v62 = vpack.c.bf16 %v524_v56, %v523_v55  ;;  %v493_v63 = vld [vmem:[%s1419_s4 + $0x50] sm:$0xff]  ;;  %v494_v0 = vld [vmem:[%s1419_s4 + $0x58] sm:$0xff]  ;;  %v1002_v1 = vpack.c.bf16 %v510_v58, %v509_v57 }
  0xf2   :  { %836 = vmatmul.mubr.msk.f32.vlgmr.msra.gmra.mrb[4].mxu0 %vm244_vm10, %v240_v10  ;;  %840 = vmatmul.mubr.msk.f32.vlgmr.msra.gmra.mrb[4].mxu1 %vm244_vm10, %v240_v10  ;;  %v1004_v10 = vpack.c.bf16 %v494_v0, %v493_v63 }
  0xf3   :  { %327 = vmatprep.mubr.f32.mxu0 %v1059_v3  ;;  %416 = vmatprep.mubr.f32.mxu1 %v1059_v3 }
  0xf4   :  { %985 = vmatpush3.bf16.msra.mxu0 %v984_v11  ;;  %1017 = vmatpush3.bf16.msra.mxu1 %v1016_v12  ;;  %v1036_v11 = vpack.c.bf16 %v526_v5, %v525_v4  ;;  %v495_v12 = vld [vmem:[%s1419_s4 + $0x60] sm:$0xff] }
  0xf5   :  { %987 = vmatprep.subr.bf16.mxu0 %v986_v15  ;;  %1019 = vmatprep.subr.bf16.mxu1 %v1018_v16  ;;  %v496_v15 = vld [vmem:[%s1419_s4 + $0x68] sm:$0xff]  ;;  %v527_v16 = vld [vmem:[%s1419_s4 + $0x160] sm:$0xff] }
  0xf6   :  { %837 = vmatmul.mubr.msk.f32.gmra.mrb[6].mxu0 %vm244_vm10, %v241_v23  ;;  %841 = vmatmul.mubr.msk.f32.gmra.mrb[6].mxu1 %vm244_vm10, %v241_v23  ;;  %v1008_v18 = vpack.c.bf16 %v496_v15, %v495_v12  ;;  %v1040_v19 = vpack.c.bf16 %v528_v17, %v527_v16  ;;  %v1010_v23 = vpack.c.bf16 %v514_v21, %v513_v20  ;;  %v717_v16 = vld [vmem:[%s1421_s3] sm:$0xff]  ;;  %v719_v17 = vld [vmem:[%s1421_s3 + $0x10] sm:$0xff] }
  0xf7   :  { %333 = vmatprep.mubr.f32.mxu0 %v1059_v3  ;;  %422 = vmatprep.mubr.f32.mxu1 %v1059_v3 }
  0xf8   :  { %989 = vmatpush3.bf16.msra.mxu0 %v988_v24  ;;  %1021 = vmatpush3.bf16.msra.mxu1 %v1020_v25  ;;  %v546_v24 = vld [vmem:[%s1419_s4 + $0x1f8] sm:$0xff]  ;;  %v497_v25 = vld [vmem:[%s1419_s4 + $0x70] sm:$0xff] }
  0xf9   :  { %991 = vmatprep.subr.bf16.mxu0 %v990_v28  ;;  %1023 = vmatprep.subr.bf16.mxu1 %v1022_v29  ;;  %v1042_v27 = vpack.c.bf16 %v546_v24, %v545_v22  ;;  %v1012_v28 = vpack.c.bf16 %v498_v26, %v497_v25  ;;  %v529_v29 = vld [vmem:[%s1419_s4 + $0x170] sm:$0xff] }
  0xfa   :  { %838 = vmatmul.mubr.msk.f32.gmra.mrb[8].mxu0 %vm244_vm10, %v242_v36  ;;  %842 = vmatmul.mubr.msk.f32.gmra.mrb[8].mxu1 %vm244_vm10, %v242_v36  ;;  %v1044_v31 = vpack.c.bf16 %v530_v30, %v529_v29 }
  0xfb   :  { %339 = vmatprep.mubr.f32.mxu0 %v1059_v3  ;;  %428 = vmatprep.mubr.f32.mxu1 %v1059_v3  ;;  %v1030_v3 = vpack.c.bf16 %v540_v48, %v539_v47 }
  0xfc   :  { %993 = vmatpush3.bf16.msra.mxu0 %v992_v37  ;;  %1025 = vmatpush3.bf16.msra.mxu1 %v1024_v38 }
  0xfd   :  { %995 = vmatprep.subr.bf16.mxu0 %v994_v41  ;;  %1027 = vmatprep.subr.bf16.mxu1 %v1026_v42 }
  0xfe   :  { %839 = vmatmul.mubr.msk.f32.gmra.mrb[10].mxu0 %vm244_vm10, %v243_v49  ;;  %843 = vmatmul.mubr.msk.f32.gmra.mrb[10].mxu1 %vm244_vm10, %v243_v49 }
 0x100   :  { %997 = vmatpush3.bf16.msra.mxu0 %v996_v50  ;;  %1029 = vmatpush3.bf16.msra.mxu1 %v1028_v51 }
 0x101   :  { %999 = vmatprep.subr.bf16.mxu0 %v998_v54  ;;  %1031 = vmatprep.subr.bf16.mxu1 %v1030_v3 }
 0x104   :  { %1001 = vmatpush3.bf16.msra.mxu0 %v1000_v61  ;;  %1033 = vmatpush3.bf16.msra.mxu1 %v1032_v62 }
 0x105   :  { %1003 = vmatprep.subr.bf16.mxu0 %v1002_v1  ;;  %1035 = vmatprep.subr.bf16.mxu1 %v1034_v2 }
 0x108   :  { %1005 = vmatpush3.bf16.msra.mxu0 %v1004_v10  ;;  %1037 = vmatpush3.bf16.msra.mxu1 %v1036_v11 }
 0x109   :  { %1007 = vmatprep.subr.bf16.mxu0 %v1006_v13  ;;  %1039 = vmatprep.subr.bf16.mxu1 %v1038_v14 }
 0x10c   :  { %1009 = vmatpush3.bf16.msra.mxu0 %v1008_v18  ;;  %1041 = vmatpush3.bf16.msra.mxu1 %v1040_v19 }
 0x10d   :  { %1011 = vmatprep.subr.bf16.mxu0 %v1010_v23  ;;  %1043 = vmatprep.subr.bf16.mxu1 %v1042_v27 }
 0x110   :  { %1013 = vmatpush3.bf16.msra.mxu0 %v1012_v28  ;;  %1045 = vmatpush3.bf16.msra.mxu1 %v1044_v31 }
 0x1c5   :  { %v323_v32 = vpop.f32.mrb[4].mxu0  ;;  %v412_v33 = vpop.f32.mrb[4].mxu1 }
 0x1c6   :  { %v451_v34 = vmul.f32 0.2, %v323_v32  ;;  %v453_v35 = vmul.f32 0.2, %v412_v33  ;;  %vm435_vm11 = vcmp.gt.f32.partialorder %v323_v32, 0.0  ;;  %vm437_vm12 = vcmp.gt.f32.partialorder %v412_v33, 0.0 }
 0x1c7   :  { %v325_v36 = vpop.f32.mrb[5].mxu0  ;;  %v414_v37 = vpop.f32.mrb[5].mxu1 }
 0x1c8   :  { %vm436_vm13 = vcmp.gt.f32.partialorder %v325_v36, 0.0  ;;  %v452_v38 = vmul.f32 0.2, %v325_v36  ;;  %vm438_vm14 = vcmp.gt.f32.partialorder %v414_v37, 0.0  ;;  %v454_v39 = vmul.f32 0.2, %v414_v37 }
 0x1c9   :  { %v329_v40 = vpop.f32.mrb[6].mxu0  ;;  %v418_v41 = vpop.f32.mrb[6].mxu1  ;;  %v467_v42 = vsel %vm435_vm11, %v323_v32, %v451_v34  ;;  %v469_v43 = vsel %vm437_vm12, %v412_v33, %v453_v35  ;;  %vm721_vm11 = vcmask 261120   ;;  %vm819_vm12 = vcmask 15360  }
 0x1ca   :  { %v455_v44 = vmul.f32 0.2, %v329_v40  ;;  %v457_v45 = vmul.f32 0.2, %v418_v41  ;;  %vm439_vm15 = vcmp.gt.f32.partialorder %v329_v40, 0.0  ;;  %vm441_vm0 = vcmp.gt.f32.partialorder %v418_v41, 0.0 }
 0x1cb   :  { %v331_v46 = vpop.f32.mrb[7].mxu0  ;;  %v420_v47 = vpop.f32.mrb[7].mxu1  ;;  %v468_v48 = vsel %vm436_vm13, %v325_v36, %v452_v38  ;;  %v470_v49 = vsel %vm438_vm14, %v414_v37, %v454_v39 }
 0x1cc   :  { %vm440_vm1 = vcmp.gt.f32.partialorder %v331_v46, 0.0  ;;  %v456_v50 = vmul.f32 0.2, %v331_v46  ;;  %vm442_vm2 = vcmp.gt.f32.partialorder %v420_v47, 0.0  ;;  %v458_v51 = vmul.f32 0.2, %v420_v47  ;;  %611 = vmatprep.mubr.f32.mxu0 %v468_v48  ;;  %696 = vmatprep.mubr.f32.mxu1 %v470_v49 }
 0x1cd   :  { %612 = vmatmul.mubr.f32.vlgmr.msra.gmra.mrb[12].mxu0 %v467_v42  ;;  %697 = vmatmul.mubr.f32.vlgmr.msra.gmra.mrb[12].mxu1 %v469_v43  ;;  %v335_v52 = vpop.f32.mrb[8].mxu0  ;;  %v424_v53 = vpop.f32.mrb[8].mxu1  ;;  %v471_v55 = vsel %vm439_vm15, %v329_v40, %v455_v44  ;;  %v473_v56 = vsel %vm441_vm0, %v418_v41, %v457_v45  ;;  %v718_v48 = vld [vmem:[%s1421_s3 + $0x8] sm:$0xff]  ;;  %v720_v49 = vld [vmem:[%s1421_s3 + $0x18] sm:$0xff] }
 0x1ce   :  { %v459_v54 = vmul.f32 0.2, %v335_v52  ;;  %v461_v3 = vmul.f32 0.2, %v424_v53  ;;  %vm443_vm3 = vcmp.gt.f32.partialorder %v335_v52, 0.0  ;;  %vm445_vm4 = vcmp.gt.f32.partialorder %v424_v53, 0.0 }
 0x1cf   :  { %v337_v57 = vpop.f32.mrb[9].mxu0  ;;  %v426_v58 = vpop.f32.mrb[9].mxu1  ;;  %v472_v59 = vsel %vm440_vm1, %v331_v46, %v456_v50  ;;  %v474_v60 = vsel %vm442_vm2, %v420_v47, %v458_v51 }
 0x1d0   :  { %vm444_vm5 = vcmp.gt.f32.partialorder %v337_v57, 0.0  ;;  %v460_v61 = vmul.f32 0.2, %v337_v57  ;;  %vm446_vm6 = vcmp.gt.f32.partialorder %v426_v58, 0.0  ;;  %v462_v62 = vmul.f32 0.2, %v426_v58  ;;  %616 = vmatprep.mubr.f32.mxu0 %v472_v59  ;;  %701 = vmatprep.mubr.f32.mxu1 %v474_v60 }
 0x1d1   :  { %617 = vmatmul.mubr.f32.gmra.mrb[14].mxu0 %v471_v55  ;;  %702 = vmatmul.mubr.f32.gmra.mrb[14].mxu1 %v473_v56  ;;  %v341_v63 = vpop.f32.mrb[10].mxu0  ;;  %v430_v0 = vpop.f32.mrb[10].mxu1  ;;  %v475_v1 = vsel %vm443_vm3, %v335_v52, %v459_v54  ;;  %v477_v2 = vsel %vm445_vm4, %v424_v53, %v461_v3 }
 0x1d2   :  { %v463_v4 = vmul.f32 0.2, %v341_v63  ;;  %v465_v5 = vmul.f32 0.2, %v430_v0  ;;  %v343_v6 = vpop.f32.mrb[11].mxu0  ;;  %v432_v7 = vpop.f32.mrb[11].mxu1  ;;  %v476_v8 = vsel %vm444_vm5, %v337_v57, %v460_v61  ;;  %v478_v9 = vsel %vm446_vm6, %v426_v58, %v462_v62 }
 0x1d3   :  { %vm448_vm7 = vcmp.gt.f32.partialorder %v343_v6, 0.0  ;;  %v464_v10 = vmul.f32 0.2, %v343_v6  ;;  %vm450_vm8 = vcmp.gt.f32.partialorder %v432_v7, 0.0  ;;  %v466_v11 = vmul.f32 0.2, %v432_v7  ;;  %621 = vmatprep.mubr.f32.mxu0 %v476_v8  ;;  %706 = vmatprep.mubr.f32.mxu1 %v478_v9 }
 0x1d4   :  { %vm447_vm9 = vcmp.gt.f32.partialorder %v341_v63, 0.0  ;;  %vm449_vm10 = vcmp.gt.f32.partialorder %v430_v0, 0.0 }
 0x1d5   :  { %622 = vmatmul.mubr.f32.gmra.mrb[16].mxu0 %v475_v1  ;;  %707 = vmatmul.mubr.f32.gmra.mrb[16].mxu1 %v477_v2  ;;  %v480_v12 = vsel %vm448_vm7, %v343_v6, %v464_v10  ;;  %v482_v13 = vsel %vm450_vm8, %v432_v7, %v466_v11  ;;  %v479_v14 = vsel %vm447_vm9, %v341_v63, %v463_v4 }
 0x1d6   :  { %626 = vmatprep.mubr.f32.mxu0 %v480_v12  ;;  %711 = vmatprep.mubr.f32.mxu1 %v482_v13  ;;  %v481_v15 = vsel %vm449_vm10, %v430_v0, %v465_v5 }
 0x1d9   :  { %627 = vmatmul.mubr.f32.gmra.mrb[18].mxu0 %v479_v14  ;;  %712 = vmatmul.mubr.f32.gmra.mrb[18].mxu1 %v481_v15 }
 0x1da   :  { %952 = vmatprep.mubr.msk.f32.mxu0 %vm721_vm11, %v717_v16  ;;  %955 = vmatprep.mubr.msk.f32.mxu1 %vm721_vm11, %v719_v17 }
 0x2a0   :  { %v880_v18 = vpop.f32.mrb[12].mxu0  ;;  %v924_v19 = vpop.f32.mrb[12].mxu1 }
 0x2a1   :  { %v881_v20 = vpop.f32.mrb[13].mxu0  ;;  %v925_v21 = vpop.f32.mrb[13].mxu1 }
 0x2a2   :  { %v882_v22 = vadd.f32 %v881_v20, %v880_v18  ;;  %v926_v23 = vadd.f32 %v925_v21, %v924_v19 }
 0x2a4   :  { %v699_v24 = vadd.f32 %v926_v23, %v882_v22  ;;  %v883_v25 = vpop.f32.mrb[14].mxu0  ;;  %v927_v26 = vpop.f32.mrb[14].mxu1 }
 0x2a5   :  { %v884_v27 = vpop.f32.mrb[15].mxu0  ;;  %v928_v28 = vpop.f32.mrb[15].mxu1 }
 0x2a6   :  { %v885_v29 = vadd.f32 %v884_v27, %v883_v25  ;;  %v929_v30 = vadd.f32 %v928_v28, %v927_v26 }
 0x2a8   :  { %v704_v31 = vadd.f32 %v929_v30, %v885_v29  ;;  %v886_v32 = vpop.f32.mrb[16].mxu0  ;;  %v930_v33 = vpop.f32.mrb[16].mxu1 }
 0x2a9   :  { %v887_v34 = vpop.f32.mrb[17].mxu0  ;;  %v931_v35 = vpop.f32.mrb[17].mxu1 }
 0x2aa   :  { %v1046_v36 = vpack.c.bf16 %v704_v31, %v699_v24  ;;  %v888_v37 = vadd.f32 %v887_v34, %v886_v32  ;;  %v932_v38 = vadd.f32 %v931_v35, %v930_v33 }
 0x2ac   :  { %v709_v39 = vadd.f32 %v932_v38, %v888_v37  ;;  %v889_v40 = vpop.f32.mrb[18].mxu0  ;;  %v933_v41 = vpop.f32.mrb[18].mxu1  ;;  %1047 = vmatprep.subr.bf16.mxu0 %v1046_v36  ;;  %1054 = vmatprep.subr.bf16.mxu1 %v1046_v36 }
 0x2ad   :  { %v890_v42 = vpop.f32.mrb[19].mxu0  ;;  %v934_v43 = vpop.f32.mrb[19].mxu1  ;;  %1049 = vmatpush3.bf16.msra.mxu0 %v1046_v36  ;;  %1056 = vmatpush3.bf16.msra.mxu1 %v1046_v36 }
 0x2ae   :  { %v891_v44 = vadd.f32 %v890_v42, %v889_v40  ;;  %v935_v45 = vadd.f32 %v934_v43, %v933_v41 }
 0x2b0   :  { %v714_v46 = vadd.f32 %v935_v45, %v891_v44 }
 0x2b2   :  { %v1050_v47 = vpack.c.bf16 %v714_v46, %v709_v39 }
 0x2b4   :  { %1051 = vmatprep.subr.bf16.mxu0 %v1050_v47  ;;  %1055 = vmatprep.subr.bf16.mxu1 %v1050_v47 }
 0x2b5   :  { %1053 = vmatpush3.bf16.msra.mxu0 %v1050_v47  ;;  %1057 = vmatpush3.bf16.msra.mxu1 %v1050_v47 }
 0x2b8   :  { %953 = vmatmul.mubr.msk.f32.vlgmr.msra.gmra.mrb[20].mxu0 %vm721_vm11, %v718_v48  ;;  %956 = vmatmul.mubr.msk.f32.vlgmr.msra.gmra.mrb[20].mxu1 %vm721_vm11, %v720_v49 }
 0x38b   :  { %v954_v50 = vpop.f32.mrb[20].mxu0  ;;  %v957_v51 = vpop.f32.mrb[20].mxu1 }
 0x38c   :  { %821 = vst.msk [vmem:[%s1422_s5 + $0x8] sm:$0xff] %vm819_vm12, %v954_v50  ;;  %823 = vst.msk [vmem:[%s1422_s5 + $0x18] sm:$0xff] %vm819_vm12, %v957_v51  ;;  %v800_v52 = vpop.f32.mrb[21].mxu0  ;;  %v810_v53 = vpop.f32.mrb[21].mxu1 }
 0x38d   :  { %820 = vst.msk [vmem:[%s1422_s5] sm:$0xff] %vm819_vm12, %v800_v52  ;;  %822 = vst.msk [vmem:[%s1422_s5 + $0x10] sm:$0xff] %vm819_vm12, %v810_v53 }

</bundles_post_ra>
